<compile_context>
chip_gen: v6e
topology: v6e:2x2x1
jax: 0.10.0
libtpu: 0.0.40
codegen_flags: <defaults>
</compile_context>

<pallas_src>
import jax
import jax.numpy as jnp
from jax.experimental import pallas as pl
from jax.experimental.pallas import tpu as pltpu

_LANE = 128
_MAX_BLOCK_ROWS = 8192            # (8192, 128) f32 = 4 MiB per block buffer
_MIN_SPLIT_ROWS = 2048            # above ~1 MiB, force >=2 grid steps (v7x 2 TCs)
_VMEM_LIMIT_BYTES = 32 * 1024 * 1024  # 4 double-buffered 4 MiB buffers + headroom


# ----------------------------------------------------------------------------
# Variant 1: raw HBM -> HBM DMA copy (default materializing path).
# ----------------------------------------------------------------------------
def _dma_copy_kernel(x_hbm, o_hbm, sem):
    cp = pltpu.make_async_copy(x_hbm, o_hbm, sem)
    cp.start()
    cp.wait()


def pallas_identity_copy_dma(x: jax.Array) -> jax.Array:
    """Materializing identity via a single HBM->HBM DMA (any shape/dtype)."""
    return pl.pallas_call(
        _dma_copy_kernel,
        out_shape=jax.ShapeDtypeStruct(x.shape, x.dtype),
        in_specs=[pl.BlockSpec(memory_space=pl.ANY)],
        out_specs=pl.BlockSpec(memory_space=pl.ANY),
        scratch_shapes=[pltpu.SemaphoreType.DMA],
    )(x)


# ----------------------------------------------------------------------------
# Variant 2: lane-dense tiled VMEM copy.
# ----------------------------------------------------------------------------
def _vmem_copy_kernel(x_ref, o_ref):
    o_ref[...] = x_ref[...]


def _select_block_rows(rows: int) -> int:
    if rows <= _MIN_SPLIT_ROWS:
        # Single full block (full-extent block shapes are always legal).
        return rows
    # Guarantee >= 2 grid steps so the "parallel" axis can be sharded across
    # v7x's two TensorCores; keep block_rows a multiple of 8 (sublane tiling)
    # and capped at 4 MiB per buffer.
    half = pl.cdiv(rows, 2)
    half = ((half + 7) // 8) * 8
    return min(_MAX_BLOCK_ROWS, half)


def pallas_identity_copy_tiled(x: jax.Array) -> jax.Array:
    """Materializing identity via a lane-dense tiled Pallas VMEM copy."""
    total = x.size
    if total == 0:
        return x
    if total % _LANE != 0:
        # Unaligned element count: route through the raw HBM->HBM DMA copy
        # instead of a padded single-block VMEM copy (capacity hazard).
        return pallas_identity_copy_dma(x)

    rows = total // _LANE
    x2 = x.reshape(rows, _LANE)
    block_rows = _select_block_rows(rows)

    grid = (pl.cdiv(rows, block_rows),)
    spec = pl.BlockSpec((block_rows, _LANE), lambda i: (i, 0))
    y2 = pl.pallas_call(
        _vmem_copy_kernel,
        out_shape=jax.ShapeDtypeStruct((rows, _LANE), x.dtype),
        grid=grid,
        in_specs=[spec],
        out_specs=spec,
        compiler_params=pltpu.CompilerParams(
            dimension_semantics=("parallel",),
            vmem_limit_bytes=_VMEM_LIMIT_BYTES,
        ),
    )(x2)
    return y2.reshape(x.shape)


# ----------------------------------------------------------------------------
# Module forward.
# ----------------------------------------------------------------------------
def localizer_alexnet_robust_forward(
    x: jax.Array, *, force_copy: bool = False, copy_method: str = "dma"
) -> jax.Array:
    """Forward pass of LocalizerAlexNetRobust: identity.

    Fastest correct implementation is returning `x` (zero HBM traffic).
    Set `force_copy=True` to materialize a fresh buffer via Pallas:
      copy_method="dma"   -> raw HBM->HBM DMA (default, hits HBM roofline)
      copy_method="tiled" -> lane-dense tiled VMEM copy
    """
    if not force_copy:
        return x
    if copy_method == "dma":
        return pallas_identity_copy_dma(x)
    return pallas_identity_copy_tiled(x)


if __name__ == "__main__":
    key = jax.random.PRNGKey(0)
    # NCHW input consistent with an AlexNet-style localizer at small scale.
    x = jax.random.normal(key, (2, 4, 16, 16), dtype=jnp.float32)

    # Primary (zero-cost) forward path.
    y = localizer_alexnet_robust_forward(x)
    y = jax.block_until_ready(y)
    assert y.shape == x.shape and y.dtype == x.dtype
    assert bool(jnp.all(y == x))

    # Materializing paths: HBM->HBM DMA copy and tiled VMEM copy.
    y_dma = jax.block_until_ready(
        localizer_alexnet_robust_forward(x, force_copy=True, copy_method="dma")
    )
    assert y_dma.shape == x.shape and y_dma.dtype == x.dtype
    assert bool(jnp.all(y_dma == x))

    y_tiled = jax.block_until_ready(
        localizer_alexnet_robust_forward(x, force_copy=True, copy_method="tiled")
    )
    assert y_tiled.shape == x.shape and y_tiled.dtype == x.dtype
    assert bool(jnp.all(y_tiled == x))

    # Exercise the non-128-divisible fallback (routes through the DMA copy).
    x_odd = jax.random.normal(jax.random.PRNGKey(1), (3, 5, 7), dtype=jnp.float32)
    y_odd = jax.block_until_ready(pallas_identity_copy_tiled(x_odd))
    assert y_odd.shape == x_odd.shape and bool(jnp.all(y_odd == x_odd))

    print("KERNEL_OK")
</pallas_src>

<mosaic_0001>
module attributes {stable_mosaic.version = 11 : i64} {
  func.func @_dma_copy_kernel(%arg0: memref<2x4x16x16xf32, #tpu.memory_space<any>>, %arg1: memref<2x4x16x16xf32, #tpu.memory_space<any>>, %arg2: memref<!tpu.dma_semaphore, #tpu.memory_space<semaphore_mem>>) attributes {dimension_semantics = [], scalar_prefetch = 0 : i64, scratch_operands = 1 : i64, tpu.core_type = #tpu.core_type<tc>} {
    tpu.enqueue_dma source(%arg0 : memref<2x4x16x16xf32, #tpu.memory_space<any>>) target(%arg1 : memref<2x4x16x16xf32, #tpu.memory_space<any>>) target_semaphore(%arg2 : memref<!tpu.dma_semaphore, #tpu.memory_space<semaphore_mem>>)
    tpu.wait_dma2 semaphore(%arg2 : memref<!tpu.dma_semaphore, #tpu.memory_space<semaphore_mem>>) src(%arg0 : memref<2x4x16x16xf32, #tpu.memory_space<any>>) dst(%arg1 : memref<2x4x16x16xf32, #tpu.memory_space<any>>)
    return
  }
}

</mosaic_0001>

<bundles_post_ra>
// kernel: tpu_custom_call.1
= control target key start
LH: loop header
LB: loop body
LE: loop exit
PB: predicated region body
PF: predicated region fallthrough
CT: control target
= control target key end

     0   :  { %s30_s6 = smov [#allocation2]   ;;  %s31_s7 = smov 131072   ;;  %s49_s0 = inlined_call_operand.hbm [shape: f32[2,4,16,16], index: 0, kind: input, shape index: {}]   ;;  %s50_s1 = inlined_call_operand.hbm [shape: f32[2,4,16,16], index: 1, kind: output, shape index: {}]  }
   0x1   :  { %s32_s8 = smov 0  }
   0x2   :  { %12 = dma.general %s49_s0, 2048, %s50_s1, %s30_s6, %s31_s7, [#allocation4], %s32_s8, 0  }
   0x3   :  { %28 = dma.done.wait [#allocation2], 2048 }
   0x4   :  { %29 = vsyncadd [#allocation2], 4294965248 }
   0x5   :  { %18 = vsyncmov [#allocation2] }
   0x8   :  { %s19_s13 = vpop.sfrf %18 }
   0x9   :  { %p24_p0 = scmp.ne.s32.totalorder %s19_s13, 0 }
   0xb   :  { %23 = shalt.err (%p24_p0)  }

</bundles_post_ra>
